<compile_context>
chip_gen: v7x
topology: tpu7x:2x2x1
jax: 0.10.0
libtpu: 0.0.40
codegen_flags: <defaults>
</compile_context>

<pallas_src>
import jax
import jax.numpy as jnp
import numpy as np
from jax.experimental import pallas as pl
from jax.experimental.pallas import tpu as pltpu


def _sigmoid(v):
    # Exact identity sigmoid(v) == 0.5*(tanh(v/2)+1): routes the transcendental
    # to the EUP slot and avoids the VPU divide on the recurrence critical path.
    return 0.5 * jnp.tanh(0.5 * v) + 0.5


def _encoder_kernel(x_ref, wih_ref, whh_ref, b_ref, wlin_ref, blin_ref, out_ref):
    B = x_ref.shape[0]
    H = whh_ref.shape[0]

    # ---- Fused conv1x1 + flatten + LSTM input projection (one MXU matmul) ----
    # wih_ref is the conv-folded (C*W, 4H) weight; b_ref folds the conv bias.
    # Gate order follows PyTorch: [i, f, g, o]; bias = b_ih + b_hh (+ conv term).
    gx = jnp.dot(x_ref[...], wih_ref[...],
                 preferred_element_type=jnp.float32) + b_ref[...]        # (B, 4H)

    # Hoist the recurrent weight: loaded once, held in vregs for all steps.
    whh = whh_ref[...]                                                   # (H, 4H)

    row_ids = jax.lax.broadcasted_iota(jnp.int32, (B, H), 0)             # hoisted

    h = jnp.zeros((1, H), jnp.float32)
    c = jnp.zeros((1, H), jnp.float32)
    hseq = jnp.zeros((B, H), jnp.float32)                                # stays in vregs

    # Fully unrolled serial recurrence over the B "time" steps (static, tiny).
    for t in range(B):
        gh = jnp.dot(h, whh, preferred_element_type=jnp.float32)        # (1, 4H)
        g = gx[t:t + 1, :] + gh
        i_g = _sigmoid(g[:, 0 * H:1 * H])
        f_g = _sigmoid(g[:, 1 * H:2 * H])
        g_g = jnp.tanh(g[:, 2 * H:3 * H])
        o_g = _sigmoid(g[:, 3 * H:4 * H])
        c = f_g * c + i_g * g_g
        h = o_g * jnp.tanh(c)
        # Register-resident row insert (no masked VMEM store per step).
        hseq = jnp.where(row_ids == t, h, hseq)

    # ---- Linear(H -> latent) on all hidden states at once (one matmul) ----
    out = jnp.dot(hseq, wlin_ref[...],
                  preferred_element_type=jnp.float32) + blin_ref[...]
    out_ref[...] = out.astype(out_ref.dtype)


def lstmae_encoder_forward(x, params):
    """x: (B, C, W) float32. Returns (B, latent) float32."""
    B, C, W = x.shape
    H = params["w_hh"].shape[1]
    L = params["w_lin"].shape[0]

    cw = params["conv_w"].reshape(C).astype(jnp.float32)                 # (C,)
    cb = params["conv_b"].reshape(()).astype(jnp.float32)                # ()
    wih_t = params["w_ih"].T.astype(jnp.float32)                         # (W, 4H)
    whh_t = params["w_hh"].T.astype(jnp.float32)                         # (H, 4H)

    # Fold the 1x1 conv into the input projection (one-time wrapper-side prep):
    #   y[b,w]   = sum_c cw[c]*x[b,c,w] + cb
    #   gx[b,:]  = sum_w y[b,w]*wih_t[w,:] + (b_ih+b_hh)
    #            = x2d[b,:] @ wih_eff + b_eff
    wih_eff = (cw[:, None, None] * wih_t[None, :, :]).reshape(C * W, 4 * H)
    b_eff = ((params["b_ih"] + params["b_hh"]).astype(jnp.float32)
             + cb * wih_t.sum(axis=0)).reshape(1, 4 * H)

    # NOTE: weights kept f32 -- whh is hoisted into vregs so there is no
    # per-step VMEM weight reload left to halve with a bf16 cast, and f32
    # preserves exact parity with the reference at these tiny sizes.
    wlin_t = params["w_lin"].T.astype(jnp.float32)                       # (H, L)
    blin = params["b_lin"].reshape(1, L).astype(jnp.float32)

    x2d = x.reshape(B, C * W).astype(jnp.float32)                        # (B, C*W)

    vmem = pl.BlockSpec(memory_space=pltpu.MemorySpace.VMEM)
    return pl.pallas_call(
        _encoder_kernel,
        out_shape=jax.ShapeDtypeStruct((B, L), jnp.float32),
        in_specs=[vmem] * 6,
        out_specs=vmem,
    )(x2d, wih_eff, whh_t, b_eff, wlin_t, blin)


def reference_forward(x, params):
    """Pure-JAX reference mirroring the PyTorch module semantics."""
    B, C, W = x.shape
    H = params["w_hh"].shape[1]
    y = jnp.einsum("bcw,c->bw", x, params["conv_w"].reshape(C)) + params["conv_b"][0]
    wih, whh = params["w_ih"], params["w_hh"]
    b = params["b_ih"] + params["b_hh"]

    def step(carry, xt):
        h, c = carry
        g = wih @ xt + whh @ h + b
        i_g = jax.nn.sigmoid(g[0 * H:1 * H])
        f_g = jax.nn.sigmoid(g[1 * H:2 * H])
        g_g = jnp.tanh(g[2 * H:3 * H])
        o_g = jax.nn.sigmoid(g[3 * H:4 * H])
        c = f_g * c + i_g * g_g
        h = o_g * jnp.tanh(c)
        return (h, c), h

    (_, _), hs = jax.lax.scan(step, (jnp.zeros(H), jnp.zeros(H)), y)
    return hs @ params["w_lin"].T + params["b_lin"]


if __name__ == "__main__":
    # Small shapes consistent with the module's forward.
    B, C, W, H, L = 8, 4, 16, 32, 8   # batch/seq, channels, window_size, hidden, latent

    key = jax.random.PRNGKey(0)
    keys = jax.random.split(key, 9)

    def unif(k, shape, bound):
        return jax.random.uniform(k, shape, jnp.float32, -bound, bound)

    kc = 1.0 / np.sqrt(C)      # conv fan-in bound (deterministic synthetic init)
    kl = 1.0 / np.sqrt(H)      # lstm / linear bound

    params = {
        "conv_w": unif(keys[0], (1, C, 1), kc),   # Conv1d(C -> 1, k=1) weight
        "conv_b": unif(keys[1], (1,), kc),        # Conv1d bias
        "w_ih": unif(keys[2], (4 * H, W), kl),    # LSTM weight_ih_l0
        "w_hh": unif(keys[3], (4 * H, H), kl),    # LSTM weight_hh_l0
        "b_ih": unif(keys[4], (4 * H,), kl),      # LSTM bias_ih_l0
        "b_hh": unif(keys[5], (4 * H,), kl),      # LSTM bias_hh_l0
        "w_lin": unif(keys[6], (L, H), kl),       # Linear weight
        "b_lin": unif(keys[7], (L,), kl),         # Linear bias
    }
    x = jax.random.normal(keys[8], (B, C, W), jnp.float32)

    out = jax.block_until_ready(lstmae_encoder_forward(x, params))
    ref = jax.block_until_ready(reference_forward(x, params))
    np.testing.assert_allclose(np.asarray(out), np.asarray(ref), rtol=2e-3, atol=2e-3)
    assert out.shape == (B, L) and out.dtype == jnp.float32
    print("KERNEL_OK")
</pallas_src>

<mosaic_0001>
module attributes {stable_mosaic.version = 11 : i64} {
  func.func @_encoder_kernel(%arg0: memref<8x64xf32, #tpu.memory_space<vmem>>, %arg1: memref<64x128xf32, #tpu.memory_space<vmem>>, %arg2: memref<32x128xf32, #tpu.memory_space<vmem>>, %arg3: memref<1x128xf32, #tpu.memory_space<vmem>>, %arg4: memref<32x8xf32, #tpu.memory_space<vmem>>, %arg5: memref<1x8xf32, #tpu.memory_space<vmem>>, %arg6: memref<8x8xf32, #tpu.memory_space<vmem>>) attributes {dimension_semantics = [], scalar_prefetch = 0 : i64, scratch_operands = 0 : i64, tpu.core_type = #tpu.core_type<tc>} {
    %c0 = arith.constant 0 : index
    %c0_0 = arith.constant 0 : index
    %0 = vector.load %arg0[%c0, %c0_0] : memref<8x64xf32, #tpu.memory_space<vmem>>, vector<8x64xf32>
    %c0_1 = arith.constant 0 : index
    %c0_2 = arith.constant 0 : index
    %1 = vector.load %arg1[%c0_1, %c0_2] : memref<64x128xf32, #tpu.memory_space<vmem>>, vector<64x128xf32>
    %cst = arith.constant dense<0.000000e+00> : vector<8x128xf32>
    %2 = tpu.matmul %0, %1, %cst {dimension_numbers = #tpu.dot_dimension_numbers<[1], [0], [0], [1], [0, 0, 1, 1], [], []>} : vector<8x64xf32>, vector<64x128xf32>, vector<8x128xf32> -> vector<8x128xf32>
    %c0_3 = arith.constant 0 : index
    %c0_4 = arith.constant 0 : index
    %3 = vector.load %arg3[%c0_3, %c0_4] : memref<1x128xf32, #tpu.memory_space<vmem>>, vector<1x128xf32>
    %4 = vector.broadcast %3 : vector<1x128xf32> to vector<8x128xf32>
    %5 = arith.addf %2, %4 : vector<8x128xf32>
    %c0_5 = arith.constant 0 : index
    %c0_6 = arith.constant 0 : index
    %6 = vector.load %arg2[%c0_5, %c0_6] : memref<32x128xf32, #tpu.memory_space<vmem>>, vector<32x128xf32>
    %7 = tpu.iota {dimensions = array<i32: 0>} : vector<8x32xi32>
    %cst_7 = arith.constant 0.000000e+00 : f32
    %8 = vector.broadcast %cst_7 : f32 to vector<1x32xf32>
    %cst_8 = arith.constant 0.000000e+00 : f32
    %9 = vector.broadcast %cst_8 : f32 to vector<1x32xf32>
    %cst_9 = arith.constant 0.000000e+00 : f32
    %10 = vector.broadcast %cst_9 : f32 to vector<8x32xf32>
    %cst_10 = arith.constant dense<0.000000e+00> : vector<1x128xf32>
    %11 = tpu.matmul %8, %6, %cst_10 {dimension_numbers = #tpu.dot_dimension_numbers<[1], [0], [0], [1], [0, 0, 1, 1], [], []>} : vector<1x32xf32>, vector<32x128xf32>, vector<1x128xf32> -> vector<1x128xf32>
    %12 = vector.extract_strided_slice %5 {offsets = [0, 0], sizes = [1, 128], strides = [1, 1]} : vector<8x128xf32> to vector<1x128xf32>
    %13 = arith.addf %12, %11 : vector<1x128xf32>
    %14 = vector.extract_strided_slice %13 {offsets = [0, 0], sizes = [1, 32], strides = [1, 1]} : vector<1x128xf32> to vector<1x32xf32>
    %cst_11 = arith.constant 5.000000e-01 : f32
    %15 = vector.broadcast %cst_11 : f32 to vector<1x32xf32>
    %16 = arith.mulf %15, %14 : vector<1x32xf32>
    %17 = math.tanh %16 : vector<1x32xf32>
    %cst_12 = arith.constant 5.000000e-01 : f32
    %18 = vector.broadcast %cst_12 : f32 to vector<1x32xf32>
    %19 = arith.mulf %18, %17 : vector<1x32xf32>
    %cst_13 = arith.constant 5.000000e-01 : f32
    %20 = vector.broadcast %cst_13 : f32 to vector<1x32xf32>
    %21 = arith.addf %19, %20 : vector<1x32xf32>
    %22 = vector.extract_strided_slice %13 {offsets = [0, 32], sizes = [1, 32], strides = [1, 1]} : vector<1x128xf32> to vector<1x32xf32>
    %cst_14 = arith.constant 5.000000e-01 : f32
    %23 = vector.broadcast %cst_14 : f32 to vector<1x32xf32>
    %24 = arith.mulf %23, %22 : vector<1x32xf32>
    %25 = math.tanh %24 : vector<1x32xf32>
    %cst_15 = arith.constant 5.000000e-01 : f32
    %26 = vector.broadcast %cst_15 : f32 to vector<1x32xf32>
    %27 = arith.mulf %26, %25 : vector<1x32xf32>
    %cst_16 = arith.constant 5.000000e-01 : f32
    %28 = vector.broadcast %cst_16 : f32 to vector<1x32xf32>
    %29 = arith.addf %27, %28 : vector<1x32xf32>
    %30 = vector.extract_strided_slice %13 {offsets = [0, 64], sizes = [1, 32], strides = [1, 1]} : vector<1x128xf32> to vector<1x32xf32>
    %31 = math.tanh %30 : vector<1x32xf32>
    %32 = vector.extract_strided_slice %13 {offsets = [0, 96], sizes = [1, 32], strides = [1, 1]} : vector<1x128xf32> to vector<1x32xf32>
    %cst_17 = arith.constant 5.000000e-01 : f32
    %33 = vector.broadcast %cst_17 : f32 to vector<1x32xf32>
    %34 = arith.mulf %33, %32 : vector<1x32xf32>
    %35 = math.tanh %34 : vector<1x32xf32>
    %cst_18 = arith.constant 5.000000e-01 : f32
    %36 = vector.broadcast %cst_18 : f32 to vector<1x32xf32>
    %37 = arith.mulf %36, %35 : vector<1x32xf32>
    %cst_19 = arith.constant 5.000000e-01 : f32
    %38 = vector.broadcast %cst_19 : f32 to vector<1x32xf32>
    %39 = arith.addf %37, %38 : vector<1x32xf32>
    %40 = arith.mulf %29, %9 : vector<1x32xf32>
    %41 = arith.mulf %21, %31 : vector<1x32xf32>
    %42 = arith.addf %40, %41 : vector<1x32xf32>
    %43 = math.tanh %42 : vector<1x32xf32>
    %44 = arith.mulf %39, %43 : vector<1x32xf32>
    %c0_i32 = arith.constant 0 : i32
    %45 = vector.broadcast %c0_i32 : i32 to vector<8x32xi32>
    %46 = arith.cmpi eq, %7, %45 : vector<8x32xi32>
    %47 = vector.shape_cast %44 : vector<1x32xf32> to vector<1x32xf32>
    %48 = vector.broadcast %47 : vector<1x32xf32> to vector<8x32xf32>
    %49 = arith.select %46, %48, %10 : vector<8x32xi1>, vector<8x32xf32>
    %cst_20 = arith.constant dense<0.000000e+00> : vector<1x128xf32>
    %50 = tpu.matmul %44, %6, %cst_20 {dimension_numbers = #tpu.dot_dimension_numbers<[1], [0], [0], [1], [0, 0, 1, 1], [], []>} : vector<1x32xf32>, vector<32x128xf32>, vector<1x128xf32> -> vector<1x128xf32>
    %51 = vector.extract_strided_slice %5 {offsets = [1, 0], sizes = [1, 128], strides = [1, 1]} : vector<8x128xf32> to vector<1x128xf32>
    %52 = arith.addf %51, %50 : vector<1x128xf32>
    %53 = vector.extract_strided_slice %52 {offsets = [0, 0], sizes = [1, 32], strides = [1, 1]} : vector<1x128xf32> to vector<1x32xf32>
    %cst_21 = arith.constant 5.000000e-01 : f32
    %54 = vector.broadcast %cst_21 : f32 to vector<1x32xf32>
    %55 = arith.mulf %54, %53 : vector<1x32xf32>
    %56 = math.tanh %55 : vector<1x32xf32>
    %cst_22 = arith.constant 5.000000e-01 : f32
    %57 = vector.broadcast %cst_22 : f32 to vector<1x32xf32>
    %58 = arith.mulf %57, %56 : vector<1x32xf32>
    %cst_23 = arith.constant 5.000000e-01 : f32
    %59 = vector.broadcast %cst_23 : f32 to vector<1x32xf32>
    %60 = arith.addf %58, %59 : vector<1x32xf32>
    %61 = vector.extract_strided_slice %52 {offsets = [0, 32], sizes = [1, 32], strides = [1, 1]} : vector<1x128xf32> to vector<1x32xf32>
    %cst_24 = arith.constant 5.000000e-01 : f32
    %62 = vector.broadcast %cst_24 : f32 to vector<1x32xf32>
    %63 = arith.mulf %62, %61 : vector<1x32xf32>
    %64 = math.tanh %63 : vector<1x32xf32>
    %cst_25 = arith.constant 5.000000e-01 : f32
    %65 = vector.broadcast %cst_25 : f32 to vector<1x32xf32>
    %66 = arith.mulf %65, %64 : vector<1x32xf32>
    %cst_26 = arith.constant 5.000000e-01 : f32
    %67 = vector.broadcast %cst_26 : f32 to vector<1x32xf32>
    %68 = arith.addf %66, %67 : vector<1x32xf32>
    %69 = vector.extract_strided_slice %52 {offsets = [0, 64], sizes = [1, 32], strides = [1, 1]} : vector<1x128xf32> to vector<1x32xf32>
    %70 = math.tanh %69 : vector<1x32xf32>
    %71 = vector.extract_strided_slice %52 {offsets = [0, 96], sizes = [1, 32], strides = [1, 1]} : vector<1x128xf32> to vector<1x32xf32>
    %cst_27 = arith.constant 5.000000e-01 : f32
    %72 = vector.broadcast %cst_27 : f32 to vector<1x32xf32>
    %73 = arith.mulf %72, %71 : vector<1x32xf32>
    %74 = math.tanh %73 : vector<1x32xf32>
    %cst_28 = arith.constant 5.000000e-01 : f32
    %75 = vector.broadcast %cst_28 : f32 to vector<1x32xf32>
    %76 = arith.mulf %75, %74 : vector<1x32xf32>
    %cst_29 = arith.constant 5.000000e-01 : f32
    %77 = vector.broadcast %cst_29 : f32 to vector<1x32xf32>
    %78 = arith.addf %76, %77 : vector<1x32xf32>
    %79 = arith.mulf %68, %42 : vector<1x32xf32>
    %80 = arith.mulf %60, %70 : vector<1x32xf32>
    %81 = arith.addf %79, %80 : vector<1x32xf32>
    %82 = math.tanh %81 : vector<1x32xf32>
    %83 = arith.mulf %78, %82 : vector<1x32xf32>
    %c1_i32 = arith.constant 1 : i32
    %84 = vector.broadcast %c1_i32 : i32 to vector<8x32xi32>
    %85 = arith.cmpi eq, %7, %84 : vector<8x32xi32>
    %86 = vector.shape_cast %83 : vector<1x32xf32> to vector<1x32xf32>
    %87 = vector.broadcast %86 : vector<1x32xf32> to vector<8x32xf32>
    %88 = arith.select %85, %87, %49 : vector<8x32xi1>, vector<8x32xf32>
    %cst_30 = arith.constant dense<0.000000e+00> : vector<1x128xf32>
    %89 = tpu.matmul %83, %6, %cst_30 {dimension_numbers = #tpu.dot_dimension_numbers<[1], [0], [0], [1], [0, 0, 1, 1], [], []>} : vector<1x32xf32>, vector<32x128xf32>, vector<1x128xf32> -> vector<1x128xf32>
    %90 = vector.extract_strided_slice %5 {offsets = [2, 0], sizes = [1, 128], strides = [1, 1]} : vector<8x128xf32> to vector<1x128xf32>
    %91 = arith.addf %90, %89 : vector<1x128xf32>
    %92 = vector.extract_strided_slice %91 {offsets = [0, 0], sizes = [1, 32], strides = [1, 1]} : vector<1x128xf32> to vector<1x32xf32>
    %cst_31 = arith.constant 5.000000e-01 : f32
    %93 = vector.broadcast %cst_31 : f32 to vector<1x32xf32>
    %94 = arith.mulf %93, %92 : vector<1x32xf32>
    %95 = math.tanh %94 : vector<1x32xf32>
    %cst_32 = arith.constant 5.000000e-01 : f32
    %96 = vector.broadcast %cst_32 : f32 to vector<1x32xf32>
    %97 = arith.mulf %96, %95 : vector<1x32xf32>
    %cst_33 = arith.constant 5.000000e-01 : f32
    %98 = vector.broadcast %cst_33 : f32 to vector<1x32xf32>
    %99 = arith.addf %97, %98 : vector<1x32xf32>
    %100 = vector.extract_strided_slice %91 {offsets = [0, 32], sizes = [1, 32], strides = [1, 1]} : vector<1x128xf32> to vector<1x32xf32>
    %cst_34 = arith.constant 5.000000e-01 : f32
    %101 = vector.broadcast %cst_34 : f32 to vector<1x32xf32>
    %102 = arith.mulf %101, %100 : vector<1x32xf32>
    %103 = math.tanh %102 : vector<1x32xf32>
    %cst_35 = arith.constant 5.000000e-01 : f32
    %104 = vector.broadcast %cst_35 : f32 to vector<1x32xf32>
    %105 = arith.mulf %104, %103 : vector<1x32xf32>
    %cst_36 = arith.constant 5.000000e-01 : f32
    %106 = vector.broadcast %cst_36 : f32 to vector<1x32xf32>
    %107 = arith.addf %105, %106 : vector<1x32xf32>
    %108 = vector.extract_strided_slice %91 {offsets = [0, 64], sizes = [1, 32], strides = [1, 1]} : vector<1x128xf32> to vector<1x32xf32>
    %109 = math.tanh %108 : vector<1x32xf32>
    %110 = vector.extract_strided_slice %91 {offsets = [0, 96], sizes = [1, 32], strides = [1, 1]} : vector<1x128xf32> to vector<1x32xf32>
    %cst_37 = arith.constant 5.000000e-01 : f32
    %111 = vector.broadcast %cst_37 : f32 to vector<1x32xf32>
    %112 = arith.mulf %111, %110 : vector<1x32xf32>
    %113 = math.tanh %112 : vector<1x32xf32>
    %cst_38 = arith.constant 5.000000e-01 : f32
    %114 = vector.broadcast %cst_38 : f32 to vector<1x32xf32>
    %115 = arith.mulf %114, %113 : vector<1x32xf32>
    %cst_39 = arith.constant 5.000000e-01 : f32
    %116 = vector.broadcast %cst_39 : f32 to vector<1x32xf32>
    %117 = arith.addf %115, %116 : vector<1x32xf32>
    %118 = arith.mulf %107, %81 : vector<1x32xf32>
    %119 = arith.mulf %99, %109 : vector<1x32xf32>
    %120 = arith.addf %118, %119 : vector<1x32xf32>
    %121 = math.tanh %120 : vector<1x32xf32>
    %122 = arith.mulf %117, %121 : vector<1x32xf32>
    %c2_i32 = arith.constant 2 : i32
    %123 = vector.broadcast %c2_i32 : i32 to vector<8x32xi32>
    %124 = arith.cmpi eq, %7, %123 : vector<8x32xi32>
    %125 = vector.shape_cast %122 : vector<1x32xf32> to vector<1x32xf32>
    %126 = vector.broadcast %125 : vector<1x32xf32> to vector<8x32xf32>
    %127 = arith.select %124, %126, %88 : vector<8x32xi1>, vector<8x32xf32>
    %cst_40 = arith.constant dense<0.000000e+00> : vector<1x128xf32>
    %128 = tpu.matmul %122, %6, %cst_40 {dimension_numbers = #tpu.dot_dimension_numbers<[1], [0], [0], [1], [0, 0, 1, 1], [], []>} : vector<1x32xf32>, vector<32x128xf32>, vector<1x128xf32> -> vector<1x128xf32>
    %129 = vector.extract_strided_slice %5 {offsets = [3, 0], sizes = [1, 128], strides = [1, 1]} : vector<8x128xf32> to vector<1x128xf32>
    %130 = arith.addf %129, %128 : vector<1x128xf32>
    %131 = vector.extract_strided_slice %130 {offsets = [0, 0], sizes = [1, 32], strides = [1, 1]} : vector<1x128xf32> to vector<1x32xf32>
    %cst_41 = arith.constant 5.000000e-01 : f32
    %132 = vector.broadcast %cst_41 : f32 to vector<1x32xf32>
    %133 = arith.mulf %132, %131 : vector<1x32xf32>
    %134 = math.tanh %133 : vector<1x32xf32>
    %cst_42 = arith.constant 5.000000e-01 : f32
    %135 = vector.broadcast %cst_42 : f32 to vector<1x32xf32>
    %136 = arith.mulf %135, %134 : vector<1x32xf32>
    %cst_43 = arith.constant 5.000000e-01 : f32
    %137 = vector.broadcast %cst_43 : f32 to vector<1x32xf32>
    %138 = arith.addf %136, %137 : vector<1x32xf32>
    %139 = vector.extract_strided_slice %130 {offsets = [0, 32], sizes = [1, 32], strides = [1, 1]} : vector<1x128xf32> to vector<1x32xf32>
    %cst_44 = arith.constant 5.000000e-01 : f32
    %140 = vector.broadcast %cst_44 : f32 to vector<1x32xf32>
    %141 = arith.mulf %140, %139 : vector<1x32xf32>
    %142 = math.tanh %141 : vector<1x32xf32>
    %cst_45 = arith.constant 5.000000e-01 : f32
    %143 = vector.broadcast %cst_45 : f32 to vector<1x32xf32>
    %144 = arith.mulf %143, %142 : vector<1x32xf32>
    %cst_46 = arith.constant 5.000000e-01 : f32
    %145 = vector.broadcast %cst_46 : f32 to vector<1x32xf32>
    %146 = arith.addf %144, %145 : vector<1x32xf32>
    %147 = vector.extract_strided_slice %130 {offsets = [0, 64], sizes = [1, 32], strides = [1, 1]} : vector<1x128xf32> to vector<1x32xf32>
    %148 = math.tanh %147 : vector<1x32xf32>
    %149 = vector.extract_strided_slice %130 {offsets = [0, 96], sizes = [1, 32], strides = [1, 1]} : vector<1x128xf32> to vector<1x32xf32>
    %cst_47 = arith.constant 5.000000e-01 : f32
    %150 = vector.broadcast %cst_47 : f32 to vector<1x32xf32>
    %151 = arith.mulf %150, %149 : vector<1x32xf32>
    %152 = math.tanh %151 : vector<1x32xf32>
    %cst_48 = arith.constant 5.000000e-01 : f32
    %153 = vector.broadcast %cst_48 : f32 to vector<1x32xf32>
    %154 = arith.mulf %153, %152 : vector<1x32xf32>
    %cst_49 = arith.constant 5.000000e-01 : f32
    %155 = vector.broadcast %cst_49 : f32 to vector<1x32xf32>
    %156 = arith.addf %154, %155 : vector<1x32xf32>
    %157 = arith.mulf %146, %120 : vector<1x32xf32>
    %158 = arith.mulf %138, %148 : vector<1x32xf32>
    %159 = arith.addf %157, %158 : vector<1x32xf32>
    %160 = math.tanh %159 : vector<1x32xf32>
    %161 = arith.mulf %156, %160 : vector<1x32xf32>
    %c3_i32 = arith.constant 3 : i32
    %162 = vector.broadcast %c3_i32 : i32 to vector<8x32xi32>
    %163 = arith.cmpi eq, %7, %162 : vector<8x32xi32>
    %164 = vector.shape_cast %161 : vector<1x32xf32> to vector<1x32xf32>
    %165 = vector.broadcast %164 : vector<1x32xf32> to vector<8x32xf32>
    %166 = arith.select %163, %165, %127 : vector<8x32xi1>, vector<8x32xf32>
    %cst_50 = arith.constant dense<0.000000e+00> : vector<1x128xf32>
    %167 = tpu.matmul %161, %6, %cst_50 {dimension_numbers = #tpu.dot_dimension_numbers<[1], [0], [0], [1], [0, 0, 1, 1], [], []>} : vector<1x32xf32>, vector<32x128xf32>, vector<1x128xf32> -> vector<1x128xf32>
    %168 = vector.extract_strided_slice %5 {offsets = [4, 0], sizes = [1, 128], strides = [1, 1]} : vector<8x128xf32> to vector<1x128xf32>
    %169 = arith.addf %168, %167 : vector<1x128xf32>
    %170 = vector.extract_strided_slice %169 {offsets = [0, 0], sizes = [1, 32], strides = [1, 1]} : vector<1x128xf32> to vector<1x32xf32>
    %cst_51 = arith.constant 5.000000e-01 : f32
    %171 = vector.broadcast %cst_51 : f32 to vector<1x32xf32>
    %172 = arith.mulf %171, %170 : vector<1x32xf32>
    %173 = math.tanh %172 : vector<1x32xf32>
    %cst_52 = arith.constant 5.000000e-01 : f32
    %174 = vector.broadcast %cst_52 : f32 to vector<1x32xf32>
    %175 = arith.mulf %174, %173 : vector<1x32xf32>
    %cst_53 = arith.constant 5.000000e-01 : f32
    %176 = vector.broadcast %cst_53 : f32 to vector<1x32xf32>
    %177 = arith.addf %175, %176 : vector<1x32xf32>
    %178 = vector.extract_strided_slice %169 {offsets = [0, 32], sizes = [1, 32], strides = [1, 1]} : vector<1x128xf32> to vector<1x32xf32>
    %cst_54 = arith.constant 5.000000e-01 : f32
    %179 = vector.broadcast %cst_54 : f32 to vector<1x32xf32>
    %180 = arith.mulf %179, %178 : vector<1x32xf32>
    %181 = math.tanh %180 : vector<1x32xf32>
    %cst_55 = arith.constant 5.000000e-01 : f32
    %182 = vector.broadcast %cst_55 : f32 to vector<1x32xf32>
    %183 = arith.mulf %182, %181 : vector<1x32xf32>
    %cst_56 = arith.constant 5.000000e-01 : f32
    %184 = vector.broadcast %cst_56 : f32 to vector<1x32xf32>
    %185 = arith.addf %183, %184 : vector<1x32xf32>
    %186 = vector.extract_strided_slice %169 {offsets = [0, 64], sizes = [1, 32], strides = [1, 1]} : vector<1x128xf32> to vector<1x32xf32>
    %187 = math.tanh %186 : vector<1x32xf32>
    %188 = vector.extract_strided_slice %169 {offsets = [0, 96], sizes = [1, 32], strides = [1, 1]} : vector<1x128xf32> to vector<1x32xf32>
    %cst_57 = arith.constant 5.000000e-01 : f32
    %189 = vector.broadcast %cst_57 : f32 to vector<1x32xf32>
    %190 = arith.mulf %189, %188 : vector<1x32xf32>
    %191 = math.tanh %190 : vector<1x32xf32>
    %cst_58 = arith.constant 5.000000e-01 : f32
    %192 = vector.broadcast %cst_58 : f32 to vector<1x32xf32>
    %193 = arith.mulf %192, %191 : vector<1x32xf32>
    %cst_59 = arith.constant 5.000000e-01 : f32
    %194 = vector.broadcast %cst_59 : f32 to vector<1x32xf32>
    %195 = arith.addf %193, %194 : vector<1x32xf32>
    %196 = arith.mulf %185, %159 : vector<1x32xf32>
    %197 = arith.mulf %177, %187 : vector<1x32xf32>
    %198 = arith.addf %196, %197 : vector<1x32xf32>
    %199 = math.tanh %198 : vector<1x32xf32>
    %200 = arith.mulf %195, %199 : vector<1x32xf32>
    %c4_i32 = arith.constant 4 : i32
    %201 = vector.broadcast %c4_i32 : i32 to vector<8x32xi32>
    %202 = arith.cmpi eq, %7, %201 : vector<8x32xi32>
    %203 = vector.shape_cast %200 : vector<1x32xf32> to vector<1x32xf32>
    %204 = vector.broadcast %203 : vector<1x32xf32> to vector<8x32xf32>
    %205 = arith.select %202, %204, %166 : vector<8x32xi1>, vector<8x32xf32>
    %cst_60 = arith.constant dense<0.000000e+00> : vector<1x128xf32>
    %206 = tpu.matmul %200, %6, %cst_60 {dimension_numbers = #tpu.dot_dimension_numbers<[1], [0], [0], [1], [0, 0, 1, 1], [], []>} : vector<1x32xf32>, vector<32x128xf32>, vector<1x128xf32> -> vector<1x128xf32>
    %207 = vector.extract_strided_slice %5 {offsets = [5, 0], sizes = [1, 128], strides = [1, 1]} : vector<8x128xf32> to vector<1x128xf32>
    %208 = arith.addf %207, %206 : vector<1x128xf32>
    %209 = vector.extract_strided_slice %208 {offsets = [0, 0], sizes = [1, 32], strides = [1, 1]} : vector<1x128xf32> to vector<1x32xf32>
    %cst_61 = arith.constant 5.000000e-01 : f32
    %210 = vector.broadcast %cst_61 : f32 to vector<1x32xf32>
    %211 = arith.mulf %210, %209 : vector<1x32xf32>
    %212 = math.tanh %211 : vector<1x32xf32>
    %cst_62 = arith.constant 5.000000e-01 : f32
    %213 = vector.broadcast %cst_62 : f32 to vector<1x32xf32>
    %214 = arith.mulf %213, %212 : vector<1x32xf32>
    %cst_63 = arith.constant 5.000000e-01 : f32
    %215 = vector.broadcast %cst_63 : f32 to vector<1x32xf32>
    %216 = arith.addf %214, %215 : vector<1x32xf32>
    %217 = vector.extract_strided_slice %208 {offsets = [0, 32], sizes = [1, 32], strides = [1, 1]} : vector<1x128xf32> to vector<1x32xf32>
    %cst_64 = arith.constant 5.000000e-01 : f32
    %218 = vector.broadcast %cst_64 : f32 to vector<1x32xf32>
    %219 = arith.mulf %218, %217 : vector<1x32xf32>
    %220 = math.tanh %219 : vector<1x32xf32>
    %cst_65 = arith.constant 5.000000e-01 : f32
    %221 = vector.broadcast %cst_65 : f32 to vector<1x32xf32>
    %222 = arith.mulf %221, %220 : vector<1x32xf32>
    %cst_66 = arith.constant 5.000000e-01 : f32
    %223 = vector.broadcast %cst_66 : f32 to vector<1x32xf32>
    %224 = arith.addf %222, %223 : vector<1x32xf32>
    %225 = vector.extract_strided_slice %208 {offsets = [0, 64], sizes = [1, 32], strides = [1, 1]} : vector<1x128xf32> to vector<1x32xf32>
    %226 = math.tanh %225 : vector<1x32xf32>
    %227 = vector.extract_strided_slice %208 {offsets = [0, 96], sizes = [1, 32], strides = [1, 1]} : vector<1x128xf32> to vector<1x32xf32>
    %cst_67 = arith.constant 5.000000e-01 : f32
    %228 = vector.broadcast %cst_67 : f32 to vector<1x32xf32>
    %229 = arith.mulf %228, %227 : vector<1x32xf32>
    %230 = math.tanh %229 : vector<1x32xf32>
    %cst_68 = arith.constant 5.000000e-01 : f32
    %231 = vector.broadcast %cst_68 : f32 to vector<1x32xf32>
    %232 = arith.mulf %231, %230 : vector<1x32xf32>
    %cst_69 = arith.constant 5.000000e-01 : f32
    %233 = vector.broadcast %cst_69 : f32 to vector<1x32xf32>
    %234 = arith.addf %232, %233 : vector<1x32xf32>
    %235 = arith.mulf %224, %198 : vector<1x32xf32>
    %236 = arith.mulf %216, %226 : vector<1x32xf32>
    %237 = arith.addf %235, %236 : vector<1x32xf32>
    %238 = math.tanh %237 : vector<1x32xf32>
    %239 = arith.mulf %234, %238 : vector<1x32xf32>
    %c5_i32 = arith.constant 5 : i32
    %240 = vector.broadcast %c5_i32 : i32 to vector<8x32xi32>
    %241 = arith.cmpi eq, %7, %240 : vector<8x32xi32>
    %242 = vector.shape_cast %239 : vector<1x32xf32> to vector<1x32xf32>
    %243 = vector.broadcast %242 : vector<1x32xf32> to vector<8x32xf32>
    %244 = arith.select %241, %243, %205 : vector<8x32xi1>, vector<8x32xf32>
    %cst_70 = arith.constant dense<0.000000e+00> : vector<1x128xf32>
    %245 = tpu.matmul %239, %6, %cst_70 {dimension_numbers = #tpu.dot_dimension_numbers<[1], [0], [0], [1], [0, 0, 1, 1], [], []>} : vector<1x32xf32>, vector<32x128xf32>, vector<1x128xf32> -> vector<1x128xf32>
    %246 = vector.extract_strided_slice %5 {offsets = [6, 0], sizes = [1, 128], strides = [1, 1]} : vector<8x128xf32> to vector<1x128xf32>
    %247 = arith.addf %246, %245 : vector<1x128xf32>
    %248 = vector.extract_strided_slice %247 {offsets = [0, 0], sizes = [1, 32], strides = [1, 1]} : vector<1x128xf32> to vector<1x32xf32>
    %cst_71 = arith.constant 5.000000e-01 : f32
    %249 = vector.broadcast %cst_71 : f32 to vector<1x32xf32>
    %250 = arith.mulf %249, %248 : vector<1x32xf32>
    %251 = math.tanh %250 : vector<1x32xf32>
    %cst_72 = arith.constant 5.000000e-01 : f32
    %252 = vector.broadcast %cst_72 : f32 to vector<1x32xf32>
    %253 = arith.mulf %252, %251 : vector<1x32xf32>
    %cst_73 = arith.constant 5.000000e-01 : f32
    %254 = vector.broadcast %cst_73 : f32 to vector<1x32xf32>
    %255 = arith.addf %253, %254 : vector<1x32xf32>
    %256 = vector.extract_strided_slice %247 {offsets = [0, 32], sizes = [1, 32], strides = [1, 1]} : vector<1x128xf32> to vector<1x32xf32>
    %cst_74 = arith.constant 5.000000e-01 : f32
    %257 = vector.broadcast %cst_74 : f32 to vector<1x32xf32>
    %258 = arith.mulf %257, %256 : vector<1x32xf32>
    %259 = math.tanh %258 : vector<1x32xf32>
    %cst_75 = arith.constant 5.000000e-01 : f32
    %260 = vector.broadcast %cst_75 : f32 to vector<1x32xf32>
    %261 = arith.mulf %260, %259 : vector<1x32xf32>
    %cst_76 = arith.constant 5.000000e-01 : f32
    %262 = vector.broadcast %cst_76 : f32 to vector<1x32xf32>
    %263 = arith.addf %261, %262 : vector<1x32xf32>
    %264 = vector.extract_strided_slice %247 {offsets = [0, 64], sizes = [1, 32], strides = [1, 1]} : vector<1x128xf32> to vector<1x32xf32>
    %265 = math.tanh %264 : vector<1x32xf32>
    %266 = vector.extract_strided_slice %247 {offsets = [0, 96], sizes = [1, 32], strides = [1, 1]} : vector<1x128xf32> to vector<1x32xf32>
    %cst_77 = arith.constant 5.000000e-01 : f32
    %267 = vector.broadcast %cst_77 : f32 to vector<1x32xf32>
    %268 = arith.mulf %267, %266 : vector<1x32xf32>
    %269 = math.tanh %268 : vector<1x32xf32>
    %cst_78 = arith.constant 5.000000e-01 : f32
    %270 = vector.broadcast %cst_78 : f32 to vector<1x32xf32>
    %271 = arith.mulf %270, %269 : vector<1x32xf32>
    %cst_79 = arith.constant 5.000000e-01 : f32
    %272 = vector.broadcast %cst_79 : f32 to vector<1x32xf32>
    %273 = arith.addf %271, %272 : vector<1x32xf32>
    %274 = arith.mulf %263, %237 : vector<1x32xf32>
    %275 = arith.mulf %255, %265 : vector<1x32xf32>
    %276 = arith.addf %274, %275 : vector<1x32xf32>
    %277 = math.tanh %276 : vector<1x32xf32>
    %278 = arith.mulf %273, %277 : vector<1x32xf32>
    %c6_i32 = arith.constant 6 : i32
    %279 = vector.broadcast %c6_i32 : i32 to vector<8x32xi32>
    %280 = arith.cmpi eq, %7, %279 : vector<8x32xi32>
    %281 = vector.shape_cast %278 : vector<1x32xf32> to vector<1x32xf32>
    %282 = vector.broadcast %281 : vector<1x32xf32> to vector<8x32xf32>
    %283 = arith.select %280, %282, %244 : vector<8x32xi1>, vector<8x32xf32>
    %cst_80 = arith.constant dense<0.000000e+00> : vector<1x128xf32>
    %284 = tpu.matmul %278, %6, %cst_80 {dimension_numbers = #tpu.dot_dimension_numbers<[1], [0], [0], [1], [0, 0, 1, 1], [], []>} : vector<1x32xf32>, vector<32x128xf32>, vector<1x128xf32> -> vector<1x128xf32>
    %285 = vector.extract_strided_slice %5 {offsets = [7, 0], sizes = [1, 128], strides = [1, 1]} : vector<8x128xf32> to vector<1x128xf32>
    %286 = arith.addf %285, %284 : vector<1x128xf32>
    %287 = vector.extract_strided_slice %286 {offsets = [0, 0], sizes = [1, 32], strides = [1, 1]} : vector<1x128xf32> to vector<1x32xf32>
    %cst_81 = arith.constant 5.000000e-01 : f32
    %288 = vector.broadcast %cst_81 : f32 to vector<1x32xf32>
    %289 = arith.mulf %288, %287 : vector<1x32xf32>
    %290 = math.tanh %289 : vector<1x32xf32>
    %cst_82 = arith.constant 5.000000e-01 : f32
    %291 = vector.broadcast %cst_82 : f32 to vector<1x32xf32>
    %292 = arith.mulf %291, %290 : vector<1x32xf32>
    %cst_83 = arith.constant 5.000000e-01 : f32
    %293 = vector.broadcast %cst_83 : f32 to vector<1x32xf32>
    %294 = arith.addf %292, %293 : vector<1x32xf32>
    %295 = vector.extract_strided_slice %286 {offsets = [0, 32], sizes = [1, 32], strides = [1, 1]} : vector<1x128xf32> to vector<1x32xf32>
    %cst_84 = arith.constant 5.000000e-01 : f32
    %296 = vector.broadcast %cst_84 : f32 to vector<1x32xf32>
    %297 = arith.mulf %296, %295 : vector<1x32xf32>
    %298 = math.tanh %297 : vector<1x32xf32>
    %cst_85 = arith.constant 5.000000e-01 : f32
    %299 = vector.broadcast %cst_85 : f32 to vector<1x32xf32>
    %300 = arith.mulf %299, %298 : vector<1x32xf32>
    %cst_86 = arith.constant 5.000000e-01 : f32
    %301 = vector.broadcast %cst_86 : f32 to vector<1x32xf32>
    %302 = arith.addf %300, %301 : vector<1x32xf32>
    %303 = vector.extract_strided_slice %286 {offsets = [0, 64], sizes = [1, 32], strides = [1, 1]} : vector<1x128xf32> to vector<1x32xf32>
    %304 = math.tanh %303 : vector<1x32xf32>
    %305 = vector.extract_strided_slice %286 {offsets = [0, 96], sizes = [1, 32], strides = [1, 1]} : vector<1x128xf32> to vector<1x32xf32>
    %cst_87 = arith.constant 5.000000e-01 : f32
    %306 = vector.broadcast %cst_87 : f32 to vector<1x32xf32>
    %307 = arith.mulf %306, %305 : vector<1x32xf32>
    %308 = math.tanh %307 : vector<1x32xf32>
    %cst_88 = arith.constant 5.000000e-01 : f32
    %309 = vector.broadcast %cst_88 : f32 to vector<1x32xf32>
    %310 = arith.mulf %309, %308 : vector<1x32xf32>
    %cst_89 = arith.constant 5.000000e-01 : f32
    %311 = vector.broadcast %cst_89 : f32 to vector<1x32xf32>
    %312 = arith.addf %310, %311 : vector<1x32xf32>
    %313 = arith.mulf %302, %276 : vector<1x32xf32>
    %314 = arith.mulf %294, %304 : vector<1x32xf32>
    %315 = arith.addf %313, %314 : vector<1x32xf32>
    %316 = math.tanh %315 : vector<1x32xf32>
    %317 = arith.mulf %312, %316 : vector<1x32xf32>
    %c7_i32 = arith.constant 7 : i32
    %318 = vector.broadcast %c7_i32 : i32 to vector<8x32xi32>
    %319 = arith.cmpi eq, %7, %318 : vector<8x32xi32>
    %320 = vector.shape_cast %317 : vector<1x32xf32> to vector<1x32xf32>
    %321 = vector.broadcast %320 : vector<1x32xf32> to vector<8x32xf32>
    %322 = arith.select %319, %321, %283 : vector<8x32xi1>, vector<8x32xf32>
    %c0_90 = arith.constant 0 : index
    %c0_91 = arith.constant 0 : index
    %323 = vector.load %arg4[%c0_90, %c0_91] : memref<32x8xf32, #tpu.memory_space<vmem>>, vector<32x8xf32>
    %cst_92 = arith.constant dense<0.000000e+00> : vector<8x8xf32>
    %324 = tpu.matmul %322, %323, %cst_92 {dimension_numbers = #tpu.dot_dimension_numbers<[1], [0], [0], [1], [0, 0, 1, 1], [], []>} : vector<8x32xf32>, vector<32x8xf32>, vector<8x8xf32> -> vector<8x8xf32>
    %c0_93 = arith.constant 0 : index
    %c0_94 = arith.constant 0 : index
    %325 = vector.load %arg5[%c0_93, %c0_94] : memref<1x8xf32, #tpu.memory_space<vmem>>, vector<1x8xf32>
    %326 = vector.broadcast %325 : vector<1x8xf32> to vector<8x8xf32>
    %327 = arith.addf %324, %326 : vector<8x8xf32>
    %c0_95 = arith.constant 0 : index
    %c0_96 = arith.constant 0 : index
    %328 = vector.load %arg6[%c0_95, %c0_96] : memref<8x8xf32, #tpu.memory_space<vmem>>, vector<8x8xf32>
    tpu.vector_store %arg6[%c0_95, %c0_96], %327 {strides = array<i32>} : memref<8x8xf32, #tpu.memory_space<vmem>>, vector<8x8xf32>,
    return
  }
}

</mosaic_0001>

<bundles_post_ra>
// kernel: tpu_custom_call.1
= control target key start
LH: loop header
LB: loop body
LE: loop exit
PB: predicated region body
PF: predicated region fallthrough
CT: control target
= control target key end

     0   :  { %11 = vsyncpa [#allocation3], 0  ;;  %s1702_s0 = inlined_call_operand.vmem [shape: f32[8,64], index: 0, kind: input, shape index: {}]   ;;  %s1703_s1 = inlined_call_operand.hbm [shape: f32[64,128], index: 1, kind: input, shape index: {}]   ;;  %s1704_s2 = inlined_call_operand.vmem [shape: f32[32,128], index: 2, kind: input, shape index: {}]   ;;  %s1705_s3 = inlined_call_operand.vmem [shape: f32[1,128], index: 3, kind: input, shape index: {}]   ;;  %s1706_s4 = inlined_call_operand.vmem [shape: f32[32,8], index: 4, kind: input, shape index: {}]   ;;  %s1707_s5 = inlined_call_operand.vmem [shape: f32[1,8], index: 5, kind: input, shape index: {}]   ;;  %s1708_s6 = inlined_call_operand.hbm [shape: f32[8,8], index: 6, kind: output, shape index: {}]  }
   0x1   :  { %12 = vsyncpa [#allocation4], 0  ;;  %s1470_s21 = smov [#allocation2]   ;;  %s1422_s25 = scalar_lea.hbm %s1703_s1, 1024 }
   0x2   :  { %s20_s22 = sshll.u32 %s1470_s21, 4  ;;  %p1423_p0 = scmp.ne.s32.totalorder %s1703_s1, %s1422_s25  ;;  %s21_s22 = int_to_ptr.vmem [resolvable:$true] %s20_s22 }
   0x3   :  { %p1426_p1 = scmp.lt.u32.totalorder %s1422_s25, %s1703_s1 }
   0x5   :  { %p1428_p2 = pnand %p1426_p1, %p1423_p0 }
   0x7   :  { %1431 = shalt.err (!%p1428_p2)
}
   0x8   :  { %s1432_s30 = scalar_lea.vmem %s21_s22, 1024  ;;  %p1437_p4 = scmp.lt.s32.totalorder %s21_s22, %s21_s22 }
   0x9   :  { %p1433_p3 = scmp.ne.s32.totalorder %s21_s22, %s1432_s30  ;;  %p1438_p5 = scmp.lt.s32.totalorder %s1432_s30, %s1432_s30 }
   0xb   :  { %p1439_p6 = por %p1438_p5, %p1437_p4 }
   0xd   :  { %p1440_p7 = pnand %p1439_p6, %p1433_p3 }
   0xf   :  { %1443 = shalt.err (!%p1440_p7)
}
  0x10   :  { %s1471_s7 = smov 128   ;;  %s1472_s8 = smov 8  }
  0x11   :  { %26 = dma.hbm_to_vmem [thread:$0]  %s1703_s1, 1024, %s21_s22, [#allocation3], %s1471_s7, %s1471_s7, %s1472_s8  }
  0x12   :  { %1466 = dma.done.wait [#allocation3], 1024  }
  0x13   :  { %1467 = vsyncadd [#allocation3], 4294966272  ;;  %v1473_v0 = vmov 0.0|0.0   ;;  %vm1474_vm0 = vmmov 0   ;;  %v1475_v1 = vmov 0.0   ;;  %v39_v2 = vld [vmem:[#allocation2] sm:$0xff]  ;;  %v132_v58 = vlaneseq }
  0x14   :  { %1299 = vmatprep.subr.bf16.mxu0 %v1473_v0  ;;  %1311 = vmatprep.subr.bf16.mxu1 %v1473_v0  ;;  %v40_v3 = vld [vmem:[#allocation2 + $0x8] sm:$0xff]  ;;  %v41_v4 = vld [vmem:[#allocation2 + $0x10] sm:$0xff]  ;;  %v42_v6 = vld [vmem:[#allocation2 + $0x18] sm:$0xff]  ;;  %vm54_vm1 = vcmask 523264   ;;  %s1476_s20 = smov 64   ;;  %s1477_s21 = smov 32  }
  0x15   :  { %1197 = vmatprep.mubr.msk.f32.mxu0 %vm1474_vm0, %v1475_v1  ;;  %1208 = vmatprep.mubr.msk.f32.mxu1 %vm1474_vm0, %v1475_v1  ;;  %v1300_v5 = vpack.c.bf16 %v40_v3, %v39_v2  ;;  %v128_v7 = vld [vmem:[%s1704_s2] sm:$0xff]  ;;  %v129_v8 = vld [vmem:[%s1704_s2 + $0x8] sm:$0xff]  ;;  %v1303_v9 = vpack.c.bf16 %v42_v6, %v41_v4  ;;  %v130_v11 = vld [vmem:[%s1704_s2 + $0x10] sm:$0xff]  ;;  %vm134_vm2 = vcmask 261120   ;;  %v1593_v59 = vshrl.u32 %v132_v58, 7  ;;  %s1478_s30 = smov [#allocation5]  }
  0x16   :  { %v1538_v10 = vpack.c.bf16 %v129_v8, %v128_v7  ;;  %v131_v12 = vld [vmem:[%s1704_s2 + $0x18] sm:$0xff]  ;;  %v43_v13 = vld [vmem:[#allocation2 + $0x20] sm:$0xff]  ;;  %v44_v14 = vld [vmem:[#allocation2 + $0x28] sm:$0xff]  ;;  %s1107_s7 = sshll.u32 %s1478_s30, 4  ;;  %vm1099_vm11 = vcmask 64512   ;;  %s1108_s7 = int_to_ptr.vmem [resolvable:$true] %s1107_s7 }
  0x17   :  { %1301 = vmatpush3.bf16.msra.mxu0 %v1300_v5  ;;  %v1548_v15 = vpack.c.bf16 %v131_v12, %v130_v11  ;;  %v1306_v16 = vpack.c.bf16 %v44_v14, %v43_v13  ;;  %v45_v17 = vld [vmem:[#allocation2 + $0x30] sm:$0xff]  ;;  %v46_v18 = vld [vmem:[#allocation2 + $0x38] sm:$0xff]  ;;  %v38_v20 = vld [vmem:[%s1702_s0] sm:$0xff]  ;;  %v234_v60 = vsub.s32 0, %v1593_v59  ;;  %v344_v61 = vsub.s32 1, %v1593_v59  ;;  %s1444_s8 = scalar_lea.vmem %s1108_s7, 128  ;;  %p1449_p9 = scmp.lt.s32.totalorder %s1108_s7, %s1108_s7 }
  0x18   :  { %1302 = vmatprep.subr.bf16.mxu0 %v1473_v0  ;;  %1313 = vmatpush3.bf16.msra.mxu1 %v1538_v10  ;;  %v1309_v19 = vpack.c.bf16 %v46_v18, %v45_v17  ;;  %v1116_v23 = vld [vmem:[%s1705_s3] ss:$0 sm:$0xff]  ;;  %vm231_vm3 = vcmp.eq.s32.totalorder %v1593_v59, 0  ;;  %vm341_vm4 = vcmp.eq.s32.totalorder %v1593_v59, 1  ;;  %vm452_vm5 = vcmp.eq.s32.totalorder %v1593_v59, 2  ;;  %p1445_p8 = scmp.ne.s32.totalorder %s1108_s7, %s1444_s8  ;;  %p1450_p10 = scmp.lt.s32.totalorder %s1444_s8, %s1444_s8 }
  0x19   :  { %1314 = vmatprep.subr.bf16.mxu1 %v1473_v0  ;;  %vm563_vm6 = vcmp.eq.s32.totalorder %v1593_v59, 3  ;;  %vm674_vm7 = vcmp.eq.s32.totalorder %v1593_v59, 4  ;;  %vm785_vm8 = vcmp.eq.s32.totalorder %v1593_v59, 5  ;;  %vm896_vm9 = vcmp.eq.s32.totalorder %v1593_v59, 6 }
  0x1a   :  { %vm1007_vm10 = vcmp.eq.s32.totalorder %v1593_v59, 7  ;;  %p1451_p11 = por %p1450_p10, %p1449_p9 }
  0x1b   :  { %1304 = vmatpush3.bf16.msra.mxu0 %v1303_v9 }
  0x1c   :  { %1305 = vmatprep.subr.bf16.mxu0 %v1473_v0  ;;  %1316 = vmatpush3.bf16.msra.mxu1 %v1548_v15  ;;  %p1452_p12 = pnand %p1451_p11, %p1445_p8 }
  0x1d   :  { %1317 = vmatprep.subr.bf16.mxu1 %v1473_v0 }
  0x1f   :  { %1307 = vmatpush3.bf16.msra.mxu0 %v1306_v16  ;;  %1209 = vmatmul.mubr.f32.vlgmr.msra.gmra.mrb[0].mxu1 %v1475_v1 }
  0x20   :  { %1308 = vmatprep.subr.bf16.mxu0 %v1473_v0  ;;  %1319 = vmatpush3.bf16.msra.mxu1 %v1538_v10 }
  0x21   :  { %1219 = vmatprep.mubr.msk.f32.mxu1 %vm1474_vm0, %v1475_v1  ;;  %1320 = vmatprep.subr.bf16.mxu1 %v1473_v0 }
  0x23   :  { %1310 = vmatpush3.bf16.msra.mxu0 %v1309_v19 }
  0x24   :  { %1323 = vmatprep.subr.bf16.mxu0 %v1473_v0  ;;  %1322 = vmatpush3.bf16.msra.mxu1 %v1548_v15 }
  0x25   :  { %1329 = vmatprep.subr.bf16.mxu1 %v1473_v0 }
  0x26   :  { %1198 = vmatmul.mubr.msk.f32.vlgmr.msra.gmra.mrb[0].mxu0 %vm54_vm1, %v38_v20 }
  0x27   :  { %1325 = vmatpush3.bf16.msra.mxu0 %v1538_v10  ;;  %1230 = vmatprep.mubr.msk.f32.mxu0 %vm1474_vm0, %v1475_v1 }
  0x28   :  { %1326 = vmatprep.subr.bf16.mxu0 %v1473_v0 }
  0x2b   :  { %1328 = vmatpush3.bf16.msra.mxu0 %v1548_v15 }
  0x2c   :  { %1335 = vmatprep.subr.bf16.mxu0 %v1473_v0 }
  0xf2   :  { %v204_v21 = vpop.f32.mrb[0].mxu1 }
  0xf3   :  { %v1210_v22 = vpop.f32.mrb[1].mxu1 }
  0xf9   :  { %v124_v24 = vpop.f32.mrb[0].mxu0 }
  0xfa   :  { %v1575_v25 = vadd.f32 %v1116_v23, %v124_v24  ;;  %v1199_v26 = vpop.f32.mrb[1].mxu0 }
  0xfc   :  { %v208_v27 = vadd.f32 %v204_v21, %v1575_v25 }
  0xfe   :  { %1374 = vtanh.f32 %v208_v27  ;;  %v209_v29 = vmul.f32 0.5, %v208_v27  ;;  %v455_v27 = vsub.s32 2, %v1593_v59 }
 0x100   :  { %1376 = vtanh.f32 %v209_v29 }
 0x108   :  { %v1375_v28 = vpop.eup %1374 }
 0x109   :  { %216 = vrot.lane.b32.xlu0 %v1375_v28, %s1476_s20 }
 0x10a   :  { %v1377_v30 = vpop.eup %1376 }
 0x10b   :  { %v211_v31 = vmul.f32 0.5, %v1377_v30 }
 0x10d   :  { %v212_v32 = vadd.f32 0.5, %v211_v31 }
 0x10f   :  { %v214_v35 = vmul.f32 0.0, %v212_v32 }
 0x17b   :  { %v217_v33 = vpop.permute.xlu0 %216 }
 0x17c   :  { %v219_v34 = vmul.f32 %v217_v33, %v212_v32 }
 0x17e   :  { %221 = vrot.lane.b32.xlu0 %v219_v34, %s1477_s21 }
 0x1f0   :  { %v222_v36 = vpop.permute.xlu0 %221 }
 0x1f1   :  { %v224_v37 = vadd.f32 %v222_v36, %v214_v35 }
 0x1f3   :  { %1378 = vtanh.f32 %v224_v37  ;;  %v322_v53 = vrot.slane %v224_v37, 7 }
 0x1fd   :  { %v1379_v38 = vpop.eup %1378 }
 0x1fe   :  { %227 = vrot.lane.b32.xlu1 %v1379_v38, %s1476_s20 }
 0x270   :  { %v228_v39 = vpop.permute.xlu1 %227 }
 0x271   :  { %v230_v40 = vmul.f32 %v228_v39, %v212_v32 }
 0x273   :  { %238 = vrot.lane.b32.xlu1 %v230_v40, %s1477_s21  ;;  %v235_v62 = vrot.slane %v230_v40, %v234_v60 }
 0x275   :  { %v236_v5 = vsel %vm231_vm3, %v235_v62, 0.0 }
 0x2e5   :  { %v239_v41 = vpop.permute.xlu1 %238 }
 0x2e6   :  { %1220 = vmatmul.mubr.msk.f32.vlgmr.msra.gmra.mrb[2].mxu1 %vm134_vm2, %v239_v41 }
 0x2e7   :  { %1331 = vmatpush3.bf16.msra.mxu1 %v1538_v10  ;;  %1241 = vmatprep.mubr.msk.f32.mxu1 %vm1474_vm0, %v1475_v1 }
 0x2e8   :  { %1332 = vmatprep.subr.bf16.mxu1 %v1473_v0 }
 0x2eb   :  { %1334 = vmatpush3.bf16.msra.mxu1 %v1548_v15 }
 0x2ec   :  { %1341 = vmatprep.subr.bf16.mxu1 %v1473_v0 }
 0x3b9   :  { %v308_v42 = vpop.f32.mrb[2].mxu1 }
 0x3ba   :  { %v313_v43 = vrot.slane %v308_v42, 7  ;;  %v1221_v44 = vpop.f32.mrb[3].mxu1 }
 0x3bc   :  { %v315_v45 = vadd.f32 %v313_v43, %v1575_v25 }
 0x3be   :  { %1380 = vtanh.f32 %v315_v45  ;;  %v316_v47 = vmul.f32 0.5, %v315_v45 }
 0x3c0   :  { %1382 = vtanh.f32 %v316_v47 }
 0x3c8   :  { %v1381_v46 = vpop.eup %1380 }
 0x3c9   :  { %326 = vrot.lane.b32.xlu0 %v1381_v46, %s1476_s20 }
 0x3ca   :  { %v1383_v48 = vpop.eup %1382 }
 0x3cb   :  { %v318_v49 = vmul.f32 0.5, %v1383_v48 }
 0x3cd   :  { %v319_v50 = vadd.f32 0.5, %v318_v49 }
 0x3cf   :  { %v324_v54 = vmul.f32 %v322_v53, %v319_v50 }
 0x43b   :  { %v327_v51 = vpop.permute.xlu0 %326 }
 0x43c   :  { %v329_v52 = vmul.f32 %v327_v51, %v319_v50 }
 0x43e   :  { %331 = vrot.lane.b32.xlu1 %v329_v52, %s1477_s21 }
 0x4b0   :  { %v332_v55 = vpop.permute.xlu1 %331 }
 0x4b1   :  { %v334_v56 = vadd.f32 %v332_v55, %v324_v54 }
 0x4b3   :  { %1384 = vtanh.f32 %v334_v56  ;;  %v433_v21 = vrot.slane %v334_v56, 7 }
 0x4bd   :  { %v1385_v57 = vpop.eup %1384 }
 0x4be   :  { %337 = vrot.lane.b32.xlu0 %v1385_v57, %s1476_s20 }
 0x530   :  { %v338_v63 = vpop.permute.xlu0 %337 }
 0x531   :  { %v340_v2 = vmul.f32 %v338_v63, %v319_v50  ;;  %v566_v50 = vsub.s32 3, %v1593_v59 }
 0x533   :  { %v345_v3 = vrot.slane %v340_v2, %v344_v61  ;;  %v348_v4 = vrot.slane %v340_v2, 1 }
 0x535   :  { %v346_v6 = vsel %vm341_vm4, %v345_v3, %v236_v5  ;;  %349 = vrot.lane.b32.xlu1 %v348_v4, %s1477_s21 }
 0x5a7   :  { %v350_v7 = vpop.permute.xlu1 %349 }
 0x5a8   :  { %1231 = vmatmul.mubr.msk.f32.vlgmr.msra.gmra.mrb[2].mxu0 %vm134_vm2, %v350_v7 }
 0x5a9   :  { %1337 = vmatpush3.bf16.msra.mxu0 %v1538_v10  ;;  %1252 = vmatprep.mubr.msk.f32.mxu0 %vm1474_vm0, %v1475_v1 }
 0x5aa   :  { %1338 = vmatprep.subr.bf16.mxu0 %v1473_v0 }
 0x5ad   :  { %1340 = vmatpush3.bf16.msra.mxu0 %v1548_v15 }
 0x5ae   :  { %1347 = vmatprep.subr.bf16.mxu0 %v1473_v0 }
 0x67b   :  { %v419_v8 = vpop.f32.mrb[2].mxu0 }
 0x67c   :  { %v424_v9 = vrot.slane %v419_v8, 6  ;;  %v1232_v11 = vpop.f32.mrb[3].mxu0 }
 0x67e   :  { %v426_v12 = vadd.f32 %v424_v9, %v1575_v25 }
 0x680   :  { %1386 = vtanh.f32 %v426_v12  ;;  %v427_v14 = vmul.f32 0.5, %v426_v12 }
 0x682   :  { %1388 = vtanh.f32 %v427_v14 }
 0x68a   :  { %v1387_v13 = vpop.eup %1386 }
 0x68b   :  { %437 = vrot.lane.b32.xlu0 %v1387_v13, %s1476_s20  ;;  %v677_v13 = vsub.s32 4, %v1593_v59 }
 0x68c   :  { %v1389_v16 = vpop.eup %1388 }
 0x68d   :  { %v429_v17 = vmul.f32 0.5, %v1389_v16 }
 0x68f   :  { %v430_v18 = vadd.f32 0.5, %v429_v17 }
 0x691   :  { %v435_v22 = vmul.f32 %v433_v21, %v430_v18 }
 0x6fd   :  { %v438_v19 = vpop.permute.xlu0 %437 }
 0x6fe   :  { %v440_v20 = vmul.f32 %v438_v19, %v430_v18 }
 0x700   :  { %442 = vrot.lane.b32.xlu1 %v440_v20, %s1477_s21 }
 0x772   :  { %v443_v23 = vpop.permute.xlu1 %442 }
 0x773   :  { %v445_v24 = vadd.f32 %v443_v23, %v435_v22 }
 0x775   :  { %1390 = vtanh.f32 %v445_v24  ;;  %v544_v45 = vrot.slane %v445_v24, 7 }
 0x77f   :  { %v1391_v26 = vpop.eup %1390 }
 0x780   :  { %448 = vrot.lane.b32.xlu0 %v1391_v26, %s1476_s20 }
 0x7f2   :  { %v449_v28 = vpop.permute.xlu0 %448 }
 0x7f3   :  { %v451_v29 = vmul.f32 %v449_v28, %v430_v18 }
 0x7f5   :  { %v456_v30 = vrot.slane %v451_v29, %v455_v27  ;;  %v459_v31 = vrot.slane %v451_v29, 2 }
 0x7f7   :  { %v457_v32 = vsel %vm452_vm5, %v456_v30, %v346_v6  ;;  %460 = vrot.lane.b32.xlu1 %v459_v31, %s1477_s21 }
 0x869   :  { %v461_v33 = vpop.permute.xlu1 %460 }
 0x86a   :  { %1242 = vmatmul.mubr.msk.f32.vlgmr.msra.gmra.mrb[4].mxu1 %vm134_vm2, %v461_v33 }
 0x86b   :  { %1343 = vmatpush3.bf16.msra.mxu1 %v1538_v10  ;;  %1263 = vmatprep.mubr.msk.f32.mxu1 %vm1474_vm0, %v1475_v1 }
 0x86c   :  { %1344 = vmatprep.subr.bf16.mxu1 %v1473_v0 }
 0x86f   :  { %1346 = vmatpush3.bf16.msra.mxu1 %v1548_v15 }
 0x870   :  { %1353 = vmatprep.subr.bf16.mxu1 %v1473_v0 }
 0x93d   :  { %v530_v34 = vpop.f32.mrb[4].mxu1 }
 0x93e   :  { %v535_v35 = vrot.slane %v530_v34, 5  ;;  %v1243_v36 = vpop.f32.mrb[5].mxu1 }
 0x93f   :  { %v788_v36 = vsub.s32 5, %v1593_v59 }
 0x940   :  { %v537_v37 = vadd.f32 %v535_v35, %v1575_v25 }
 0x942   :  { %1392 = vtanh.f32 %v537_v37  ;;  %v538_v39 = vmul.f32 0.5, %v537_v37 }
 0x944   :  { %1394 = vtanh.f32 %v538_v39 }
 0x94c   :  { %v1393_v38 = vpop.eup %1392 }
 0x94d   :  { %548 = vrot.lane.b32.xlu0 %v1393_v38, %s1476_s20 }
 0x94e   :  { %v1395_v40 = vpop.eup %1394 }
 0x94f   :  { %v540_v41 = vmul.f32 0.5, %v1395_v40 }
 0x951   :  { %v541_v42 = vadd.f32 0.5, %v540_v41 }
 0x953   :  { %v546_v46 = vmul.f32 %v544_v45, %v541_v42 }
 0x9bf   :  { %v549_v43 = vpop.permute.xlu0 %548 }
 0x9c0   :  { %v551_v44 = vmul.f32 %v549_v43, %v541_v42 }
 0x9c2   :  { %553 = vrot.lane.b32.xlu1 %v551_v44, %s1477_s21 }
 0xa34   :  { %v554_v47 = vpop.permute.xlu1 %553 }
 0xa35   :  { %v556_v48 = vadd.f32 %v554_v47, %v546_v46 }
 0xa37   :  { %1396 = vtanh.f32 %v556_v48  ;;  %v655_v7 = vrot.slane %v556_v48, 7 }
 0xa41   :  { %v1397_v49 = vpop.eup %1396 }
 0xa42   :  { %559 = vrot.lane.b32.xlu0 %v1397_v49, %s1476_s20 }
 0xab4   :  { %v560_v51 = vpop.permute.xlu0 %559 }
 0xab5   :  { %v562_v52 = vmul.f32 %v560_v51, %v541_v42 }
 0xab7   :  { %v567_v53 = vrot.slane %v562_v52, %v566_v50  ;;  %v570_v54 = vrot.slane %v562_v52, 3 }
 0xab9   :  { %v568_v55 = vsel %vm563_vm6, %v567_v53, %v457_v32  ;;  %571 = vrot.lane.b32.xlu1 %v570_v54, %s1477_s21 }
 0xb2b   :  { %v572_v56 = vpop.permute.xlu1 %571 }
 0xb2c   :  { %1253 = vmatmul.mubr.msk.f32.vlgmr.msra.gmra.mrb[4].mxu0 %vm134_vm2, %v572_v56 }
 0xb2d   :  { %1349 = vmatpush3.bf16.msra.mxu0 %v1538_v10  ;;  %1274 = vmatprep.mubr.msk.f32.mxu0 %vm1474_vm0, %v1475_v1 }
 0xb2e   :  { %1350 = vmatprep.subr.bf16.mxu0 %v1473_v0 }
 0xb31   :  { %1352 = vmatpush3.bf16.msra.mxu0 %v1548_v15 }
 0xb32   :  { %1359 = vmatprep.subr.bf16.mxu0 %v1473_v0 }
 0xbff   :  { %v641_v57 = vpop.f32.mrb[4].mxu0 }
 0xc00   :  { %v646_v58 = vrot.slane %v641_v57, 4  ;;  %v1254_v60 = vpop.f32.mrb[5].mxu0 }
 0xc02   :  { %v648_v61 = vadd.f32 %v646_v58, %v1575_v25  ;;  %v899_v58 = vsub.s32 6, %v1593_v59 }
 0xc04   :  { %1398 = vtanh.f32 %v648_v61  ;;  %v649_v63 = vmul.f32 0.5, %v648_v61 }
 0xc06   :  { %1400 = vtanh.f32 %v649_v63 }
 0xc0e   :  { %v1399_v62 = vpop.eup %1398 }
 0xc0f   :  { %659 = vrot.lane.b32.xlu0 %v1399_v62, %s1476_s20 }
 0xc10   :  { %v1401_v2 = vpop.eup %1400 }
 0xc11   :  { %v651_v3 = vmul.f32 0.5, %v1401_v2 }
 0xc13   :  { %v652_v4 = vadd.f32 0.5, %v651_v3 }
 0xc15   :  { %v657_v8 = vmul.f32 %v655_v7, %v652_v4 }
 0xc81   :  { %v660_v5 = vpop.permute.xlu0 %659 }
 0xc82   :  { %v662_v6 = vmul.f32 %v660_v5, %v652_v4 }
 0xc84   :  { %664 = vrot.lane.b32.xlu1 %v662_v6, %s1477_s21 }
 0xcf6   :  { %v665_v9 = vpop.permute.xlu1 %664 }
 0xcf7   :  { %v667_v11 = vadd.f32 %v665_v9, %v657_v8 }
 0xcf9   :  { %1402 = vtanh.f32 %v667_v11  ;;  %v766_v32 = vrot.slane %v667_v11, 7 }
 0xd03   :  { %v1403_v12 = vpop.eup %1402 }
 0xd04   :  { %670 = vrot.lane.b32.xlu0 %v1403_v12, %s1476_s20 }
 0xd76   :  { %v671_v14 = vpop.permute.xlu0 %670 }
 0xd77   :  { %v673_v16 = vmul.f32 %v671_v14, %v652_v4 }
 0xd79   :  { %v678_v17 = vrot.slane %v673_v16, %v677_v13  ;;  %v681_v18 = vrot.slane %v673_v16, 4 }
 0xd7b   :  { %v679_v19 = vsel %vm674_vm7, %v678_v17, %v568_v55  ;;  %682 = vrot.lane.b32.xlu1 %v681_v18, %s1477_s21 }
 0xded   :  { %v683_v20 = vpop.permute.xlu1 %682 }
 0xdee   :  { %1264 = vmatmul.mubr.msk.f32.vlgmr.msra.gmra.mrb[6].mxu1 %vm134_vm2, %v683_v20 }
 0xdef   :  { %1355 = vmatpush3.bf16.msra.mxu1 %v1538_v10  ;;  %1285 = vmatprep.mubr.msk.f32.mxu1 %vm1474_vm0, %v1475_v1 }
 0xdf0   :  { %1356 = vmatprep.subr.bf16.mxu1 %v1473_v0 }
 0xdf3   :  { %1358 = vmatpush3.bf16.msra.mxu1 %v1548_v15 }
 0xec1   :  { %v752_v21 = vpop.f32.mrb[6].mxu1 }
 0xec2   :  { %v757_v22 = vrot.slane %v752_v21, 3  ;;  %v1265_v23 = vpop.f32.mrb[7].mxu1  ;;  %v1014_v21 = vld [vmem:[%s1706_s4 + $0x8] sm:$0xff] }
 0xec4   :  { %v759_v24 = vadd.f32 %v757_v22, %v1575_v25  ;;  %v1015_v22 = vld [vmem:[%s1706_s4 + $0x10] sm:$0xff] }
 0xec6   :  { %1404 = vtanh.f32 %v759_v24  ;;  %v760_v27 = vmul.f32 0.5, %v759_v24  ;;  %v1016_v24 = vld [vmem:[%s1706_s4 + $0x18] sm:$0xff] }
 0xec8   :  { %1406 = vtanh.f32 %v760_v27 }
 0xed0   :  { %v1405_v26 = vpop.eup %1404 }
 0xed1   :  { %770 = vrot.lane.b32.xlu0 %v1405_v26, %s1476_s20  ;;  %v1363_v26 = vpack.c.bf16 %v1016_v24, %v1015_v22 }
 0xed2   :  { %v1407_v28 = vpop.eup %1406 }
 0xed3   :  { %v762_v10 = vmul.f32 0.5, %v1407_v28  ;;  %v1010_v28 = vsub.s32 7, %v1593_v59 }
 0xed5   :  { %v763_v29 = vadd.f32 0.5, %v762_v10 }
 0xed7   :  { %v768_v15 = vmul.f32 %v766_v32, %v763_v29 }
 0xf43   :  { %v771_v30 = vpop.permute.xlu0 %770 }
 0xf44   :  { %v773_v31 = vmul.f32 %v771_v30, %v763_v29 }
 0xf46   :  { %775 = vrot.lane.b32.xlu1 %v773_v31, %s1477_s21 }
 0xfb8   :  { %v776_v33 = vpop.permute.xlu1 %775 }
 0xfb9   :  { %v778_v34 = vadd.f32 %v776_v33, %v768_v15 }
 0xfbb   :  { %1408 = vtanh.f32 %v778_v34  ;;  %v877_v54 = vrot.slane %v778_v34, 7 }
 0xfc5   :  { %v1409_v35 = vpop.eup %1408 }
 0xfc6   :  { %781 = vrot.lane.b32.xlu0 %v1409_v35, %s1476_s20 }
0x1038   :  { %v782_v37 = vpop.permute.xlu0 %781 }
0x1039   :  { %v784_v38 = vmul.f32 %v782_v37, %v763_v29 }
0x103b   :  { %v789_v39 = vrot.slane %v784_v38, %v788_v36  ;;  %v792_v40 = vrot.slane %v784_v38, 5 }
0x103d   :  { %793 = vrot.lane.b32.xlu1 %v792_v40, %s1477_s21  ;;  %v790_v41 = vsel %vm785_vm8, %v789_v39, %v679_v19 }
0x10af   :  { %v794_v42 = vpop.permute.xlu1 %793 }
0x10b0   :  { %1275 = vmatmul.mubr.msk.f32.vlgmr.msra.gmra.mrb[6].mxu0 %vm134_vm2, %v794_v42 }
0x10b1   :  { %1296 = vmatprep.mubr.msk.f32.mxu0 %vm1474_vm0, %v1475_v1 }
0x1183   :  { %v863_v43 = vpop.f32.mrb[6].mxu0 }
0x1184   :  { %v868_v44 = vrot.slane %v863_v43, 2  ;;  %v1276_v45 = vpop.f32.mrb[7].mxu0 }
0x1186   :  { %v870_v46 = vadd.f32 %v868_v44, %v1575_v25 }
0x1188   :  { %1410 = vtanh.f32 %v870_v46  ;;  %v871_v48 = vmul.f32 0.5, %v870_v46 }
0x118a   :  { %1412 = vtanh.f32 %v871_v48 }
0x1192   :  { %v1411_v47 = vpop.eup %1410 }
0x1193   :  { %881 = vrot.lane.b32.xlu0 %v1411_v47, %s1476_s20 }
0x1194   :  { %v1413_v49 = vpop.eup %1412 }
0x1195   :  { %v873_v50 = vmul.f32 0.5, %v1413_v49 }
0x1197   :  { %v874_v51 = vadd.f32 0.5, %v873_v50 }
0x1199   :  { %v879_v1 = vmul.f32 %v877_v54, %v874_v51 }
0x1205   :  { %v882_v52 = vpop.permute.xlu0 %881 }
0x1206   :  { %v884_v53 = vmul.f32 %v882_v52, %v874_v51 }
0x1208   :  { %886 = vrot.lane.b32.xlu1 %v884_v53, %s1477_s21 }
0x127a   :  { %v887_v55 = vpop.permute.xlu1 %886 }
0x127b   :  { %v889_v56 = vadd.f32 %v887_v55, %v879_v1 }
0x127d   :  { %1414 = vtanh.f32 %v889_v56  ;;  %v988_v17 = vrot.slane %v889_v56, 7 }
0x1287   :  { %v1415_v57 = vpop.eup %1414 }
0x1288   :  { %892 = vrot.lane.b32.xlu0 %v1415_v57, %s1476_s20 }
0x12fa   :  { %v893_v60 = vpop.permute.xlu0 %892 }
0x12fb   :  { %v895_v61 = vmul.f32 %v893_v60, %v874_v51 }
0x12fd   :  { %v900_v62 = vrot.slane %v895_v61, %v899_v58  ;;  %v903_v63 = vrot.slane %v895_v61, 6 }
0x12ff   :  { %904 = vrot.lane.b32.xlu1 %v903_v63, %s1477_s21  ;;  %v901_v2 = vsel %vm896_vm9, %v900_v62, %v790_v41 }
0x1371   :  { %v905_v3 = vpop.permute.xlu1 %904 }
0x1372   :  { %1286 = vmatmul.mubr.msk.f32.vlgmr.msra.gmra.mrb[8].mxu1 %vm134_vm2, %v905_v3 }
0x1445   :  { %v974_v4 = vpop.f32.mrb[8].mxu1 }
0x1446   :  { %v979_v5 = vrot.slane %v974_v4, 1  ;;  %v1287_v6 = vpop.f32.mrb[9].mxu1 }
0x1448   :  { %v981_v7 = vadd.f32 %v979_v5, %v1575_v25  ;;  %v1013_v25 = vld [vmem:[%s1706_s4] sm:$0xff] }
0x1449   :  { %v1360_v23 = vpack.c.bf16 %v1014_v21, %v1013_v25 }
0x144a   :  { %1416 = vtanh.f32 %v981_v7  ;;  %v982_v9 = vmul.f32 0.5, %v981_v7 }
0x144b   :  { %1361 = vmatpush3.bf16.msra.mxu0 %v1360_v23 }
0x144c   :  { %1418 = vtanh.f32 %v982_v9  ;;  %1362 = vmatprep.subr.bf16.mxu0 %v1473_v0  ;;  %v1125_v0 = vld [vmem:[%s1707_s5] ss:$0 sm:$0xff] }
0x144f   :  { %1364 = vmatpush3.bf16.msra.mxu0 %v1363_v26 }
0x1454   :  { %v1417_v8 = vpop.eup %1416 }
0x1455   :  { %992 = vrot.lane.b32.xlu0 %v1417_v8, %s1476_s20 }
0x1456   :  { %v1419_v11 = vpop.eup %1418 }
0x1457   :  { %v984_v12 = vmul.f32 0.5, %v1419_v11 }
0x1459   :  { %v985_v13 = vadd.f32 0.5, %v984_v12 }
0x145b   :  { %v990_v18 = vmul.f32 %v988_v17, %v985_v13 }
0x14c7   :  { %v993_v14 = vpop.permute.xlu0 %992 }
0x14c8   :  { %v995_v16 = vmul.f32 %v993_v14, %v985_v13 }
0x14ca   :  { %997 = vrot.lane.b32.xlu1 %v995_v16, %s1477_s21 }
0x153c   :  { %v998_v19 = vpop.permute.xlu1 %997 }
0x153d   :  { %v1000_v20 = vadd.f32 %v998_v19, %v990_v18 }
0x153f   :  { %1420 = vtanh.f32 %v1000_v20 }
0x1549   :  { %v1421_v27 = vpop.eup %1420 }
0x154a   :  { %1003 = vrot.lane.b32.xlu0 %v1421_v27, %s1476_s20 }
0x15bc   :  { %v1004_v10 = vpop.permute.xlu0 %1003 }
0x15bd   :  { %v1006_v29 = vmul.f32 %v1004_v10, %v985_v13 }
0x15bf   :  { %v1011_v30 = vrot.slane %v1006_v29, %v1010_v28 }
0x15c1   :  { %v1012_v31 = vsel %vm1007_vm10, %v1011_v30, %v901_v2 }
0x15c2   :  { %1025 = vrot.lane.b32.xlu1 %v1012_v31, %s1477_s21 }
0x1634   :  { %v1026_v32 = vpop.permute.xlu1 %1025 }
0x1635   :  { %1297 = vmatmul.mubr.msk.f32.vlgmr.msra.gmra.mrb[8].mxu0 %vm134_vm2, %v1026_v32 }
0x1708   :  { %v1095_v15 = vpop.f32.mrb[8].mxu0 }
0x1709   :  { %v1096_v33 = vadd.f32 %v1125_v0, %v1095_v15  ;;  %v1298_v34 = vpop.f32.mrb[9].mxu0 }
0x170b   :  { %1100 = vst.msk [vmem:[#allocation5] sm:$0xff] %vm1099_vm11, %v1096_v33 }
0x170c   :  { %1455 = shalt.err (!%p1452_p12)
}
0x170d   :  { %s1456_s1 = scalar_lea.hbm %s1708_s6, 128 }
0x170e   :  { %p1457_p13 = scmp.ne.s32.totalorder %s1708_s6, %s1456_s1  ;;  %p1460_p0 = scmp.lt.u32.totalorder %s1456_s1, %s1708_s6 }
0x1710   :  { %p1462_p1 = pnand %p1460_p0, %p1457_p13 }
0x1712   :  { %1465 = shalt.err (!%p1462_p1)
}
0x1713   :  { %1110 = dma.vmem_to_hbm [thread:$0]  %s1108_s7, 128, %s1708_s6, [#allocation4]  }
0x1714   :  { %1468 = dma.done.wait [#allocation4], 128  }
0x1715   :  { %1469 = vsyncadd [#allocation4], 4294967168 }
0x1716   :  { %1114 = vsyncpa [#allocation3], 1 }
0x1717   :  { %1115 = vsyncpa [#allocation4], 1 }

</bundles_post_ra>
